<compile_context>
chip_gen: v7x
topology: tpu7x:2x2x1
jax: 0.10.0
libtpu: 0.0.40
codegen_flags: <defaults>
</compile_context>

<pallas_src>
import jax
import jax.numpy as jnp
from jax.experimental import pallas as pl
from jax.experimental.pallas import tpu as pltpu

LANE = 128
SUBLANE = 8


def _tanh_kernel(x_ref, o_ref):
    # Single EUP op; keep I/O dtype (bf16 stays bf16 on v6e/v7x).
    o_ref[...] = jnp.tanh(x_ref[...]).astype(o_ref.dtype)


def tanh_pallas(x, *, target_block_elems=512 * 1024):
    """Elementwise tanh(x) matching torch.tanh semantics (shape/dtype preserved)."""
    orig_shape = x.shape
    orig_dtype = x.dtype
    n = x.size
    if n == 0:
        return x

    # Pick the widest lane count that divides n so no padding copy is needed.
    C = None
    for cand in (1024, 512, 256, LANE):
        if n % cand == 0:
            C = cand
            break

    x_flat = jnp.reshape(x, (-1,))
    if C is None:
        # Rare fallback: pad flat tail up to a multiple of 128 lanes.
        # tanh(0) = 0 in the padded region, which is sliced off below.
        C = 512
        n_pad = pl.cdiv(n, C) * C
        x_flat = jnp.pad(x_flat, (0, n_pad - n))
    else:
        n_pad = n

    rows = n_pad // C
    x2d = x_flat.reshape(rows, C)

    # Block rows: target ~2 MiB f32 per tile (4 x tile fits v5e's 16 MiB scoped
    # VMEM and v7x's 64 MiB physical VMEM with plenty of headroom).
    if rows <= SUBLANE:
        # Single block equal to the full array dims (always a legal block shape).
        br = rows
    else:
        br = min(rows, max(SUBLANE, target_block_elems // C))
        br = max(SUBLANE, (br // SUBLANE) * SUBLANE)

    grid = (pl.cdiv(rows, br),)

    itemsize = jnp.dtype(orig_dtype).itemsize
    cost = pl.CostEstimate(
        flops=0,
        transcendentals=n,
        bytes_accessed=2 * n * itemsize,
    )

    out2d = pl.pallas_call(
        _tanh_kernel,
        out_shape=jax.ShapeDtypeStruct((rows, C), orig_dtype),
        grid_spec=pltpu.PrefetchScalarGridSpec(
            num_scalar_prefetch=0,
            grid=grid,
            in_specs=[pl.BlockSpec((br, C), lambda i: (i, 0))],
            out_specs=pl.BlockSpec((br, C), lambda i: (i, 0)),
        ),
        compiler_params=pltpu.CompilerParams(
            # Row axis is independent -> shard across both TCs on v7x megacore.
            dimension_semantics=("parallel",),
        ),
        cost_estimate=cost,
    )(x2d)

    out_flat = out2d.reshape(-1)
    if n_pad != n:
        out_flat = out_flat[:n]
    return out_flat.reshape(orig_shape)


if __name__ == "__main__":
    key = jax.random.PRNGKey(0)
    # Small NCHW-like input consistent with the module's typical usage.
    x = jax.random.normal(key, (2, 4, 16, 16), dtype=jnp.float32) * 3.0

    y = tanh_pallas(x)
    jax.block_until_ready(y)

    # Reference check against plain JAX (same math as torch.tanh).
    y_ref = jnp.tanh(x)
    assert y.shape == x.shape and y.dtype == x.dtype
    assert jnp.allclose(y, y_ref, atol=1e-6, rtol=1e-6)

    print("KERNEL_OK")
</pallas_src>

<mosaic_0001>
module attributes {stable_mosaic.version = 11 : i64} {
  func.func @_tanh_kernel(%arg0: i32, %arg1: memref<2x1024xf32, #tpu.memory_space<vmem>>, %arg2: memref<2x1024xf32, #tpu.memory_space<vmem>>) attributes {dimension_semantics = [#tpu.dimension_semantics<parallel>], iteration_bounds = array<i64: 1>, scalar_prefetch = 0 : i64, scratch_operands = 0 : i64, tpu.core_type = #tpu.core_type<tc>, window_params = [{transform_indices = @transform_0, window_bounds = array<i64: 2, 1024>}, {transform_indices = @transform_1, window_bounds = array<i64: 2, 1024>}]} {
    %c0 = arith.constant 0 : index
    %c0_0 = arith.constant 0 : index
    %0 = vector.load %arg1[%c0, %c0_0] : memref<2x1024xf32, #tpu.memory_space<vmem>>, vector<2x1024xf32>
    %1 = math.tanh %0 : vector<2x1024xf32>
    %c0_1 = arith.constant 0 : index
    %c0_2 = arith.constant 0 : index
    %2 = vector.load %arg2[%c0_1, %c0_2] : memref<2x1024xf32, #tpu.memory_space<vmem>>, vector<2x1024xf32>
    tpu.vector_store %arg2[%c0_1, %c0_2], %1 {strides = array<i32>} : memref<2x1024xf32, #tpu.memory_space<vmem>>, vector<2x1024xf32>,
    return
  }
  func.func @transform_0(%arg0: i32) -> (i32, i32) {
    %c0_i32 = arith.constant 0 : i32
    %c0_i32_0 = arith.constant 0 : i32
    return %arg0, %c0_i32 : i32, i32
  }
  func.func @transform_1(%arg0: i32) -> (i32, i32) {
    %c0_i32 = arith.constant 0 : i32
    %c0_i32_0 = arith.constant 0 : i32
    return %arg0, %c0_i32 : i32, i32
  }
}

</mosaic_0001>

<bundles_post_ra>
// kernel: tpu_custom_call.1
= control target key start
LH: loop header
LB: loop body
LE: loop exit
PB: predicated region body
PF: predicated region fallthrough
CT: control target
= control target key end

     0   :  { %6 = vsyncpa [#allocation3], 0  ;;  %s132_s0 = inlined_call_operand.hbm [shape: f32[2,1024], index: 0, kind: input, shape index: {}]   ;;  %s133_s1 = inlined_call_operand.hbm [shape: f32[2,1024], index: 1, kind: output, shape index: {}]  }
   0x1   :  { %7 = vsyncpa [#allocation4], 0  ;;  %s96_s6 = smov [#allocation2]   ;;  %s48_s10 = scalar_lea.hbm %s132_s0, 256 }
   0x2   :  { %s14_s7 = sshll.u32 %s96_s6, 4  ;;  %p49_p0 = scmp.ne.s32.totalorder %s132_s0, %s48_s10  ;;  %s15_s7 = int_to_ptr.vmem [resolvable:$true] %s14_s7 }
   0x3   :  { %p52_p1 = scmp.lt.u32.totalorder %s48_s10, %s132_s0 }
   0x5   :  { %p54_p2 = pnand %p52_p1, %p49_p0 }
   0x7   :  { %57 = shalt.err (!%p54_p2)
}
   0x8   :  { %s58_s15 = scalar_lea.vmem %s15_s7, 256  ;;  %p63_p4 = scmp.lt.s32.totalorder %s15_s7, %s15_s7 }
   0x9   :  { %p59_p3 = scmp.ne.s32.totalorder %s15_s7, %s58_s15  ;;  %p64_p5 = scmp.lt.s32.totalorder %s58_s15, %s58_s15 }
   0xb   :  { %p65_p6 = por %p64_p5, %p63_p4 }
   0xd   :  { %p66_p7 = pnand %p65_p6, %p59_p3 }
   0xf   :  { %69 = shalt.err (!%p66_p7)
}
  0x10   :  { %17 = dma.hbm_to_vmem [thread:$0]  %s132_s0, 256, %s15_s7, [#allocation3]  }
  0x11   :  { %92 = dma.done.wait [#allocation3], 256  }
  0x12   :  { %93 = vsyncadd [#allocation3], 4294967040  ;;  %v21_v0 = vld [vmem:[#allocation2] sm:$0xff]  ;;  %v22_v1 = vld [vmem:[#allocation2 + $0x8] sm:$0xff]  ;;  %s97_s18 = smov [#allocation5]  }
  0x13   :  { %44 = vtanh.f32 %v21_v0  ;;  %s33_s19 = sshll.u32 %s97_s18, 4  ;;  %s34_s19 = int_to_ptr.vmem [resolvable:$true] %s33_s19 }
  0x14   :  { %46 = vtanh.f32 %v22_v1  ;;  %s70_s20 = scalar_lea.vmem %s34_s19, 256  ;;  %p75_p9 = scmp.lt.s32.totalorder %s34_s19, %s34_s19 }
  0x15   :  { %p71_p8 = scmp.ne.s32.totalorder %s34_s19, %s70_s20  ;;  %p76_p10 = scmp.lt.s32.totalorder %s70_s20, %s70_s20 }
  0x17   :  { %p77_p11 = por %p76_p10, %p75_p9 }
  0x19   :  { %p78_p12 = pnand %p77_p11, %p71_p8 }
  0x1d   :  { %v45_v2 = vpop.eup %44 }
  0x1e   :  { %v47_v3 = vpop.eup %46  ;;  %25 = vst [vmem:[#allocation5] sm:$0xff] %v45_v2 }
  0x1f   :  { %26 = vst [vmem:[#allocation5 + $0x8] sm:$0xff] %v47_v3 }
  0x20   :  { %81 = shalt.err (!%p78_p12)
}
  0x21   :  { %s82_s22 = scalar_lea.hbm %s133_s1, 256 }
  0x22   :  { %p83_p13 = scmp.ne.s32.totalorder %s133_s1, %s82_s22  ;;  %p86_p0 = scmp.lt.u32.totalorder %s82_s22, %s133_s1 }
  0x24   :  { %p88_p1 = pnand %p86_p0, %p83_p13 }
  0x26   :  { %91 = shalt.err (!%p88_p1)
}
  0x27   :  { %36 = dma.vmem_to_hbm [thread:$0]  %s34_s19, 256, %s133_s1, [#allocation4]  }
  0x28   :  { %94 = dma.done.wait [#allocation4], 256  }
  0x29   :  { %95 = vsyncadd [#allocation4], 4294967040 }
  0x2a   :  { %40 = vsyncpa [#allocation3], 1 }
  0x2b   :  { %41 = vsyncpa [#allocation4], 1 }

</bundles_post_ra>
